<compile_context>
chip_gen: v7x
topology: tpu7x:2x2x1
jax: 0.10.0
libtpu: 0.0.40
codegen_flags: <defaults>
</compile_context>

<pallas_src>
import jax
import jax.numpy as jnp
from jax.experimental import pallas as pl
from jax.experimental.pallas import tpu as pltpu


def _pos_embed_kernel(col_ref, row_ref, out_ref):
    # col_ref: (F, 1, W)  column (x) embeddings, channel-major: col_ref[c, 0, x]
    # row_ref: (F, H, 1)  row    (y) embeddings, channel-major: row_ref[c, y, 0]
    # out_ref: (2F, H, W) NCHW positional encoding (single batch copy)
    F, _, W = col_ref.shape
    _, H, _ = row_ref.shape
    # x half: out[c, y, x] = col[c, x]   -> broadcast along H (sublane axis).
    out_ref[:F] = jnp.broadcast_to(col_ref[...], (F, H, W))
    # y half: out[F+c, y, x] = row[c, y] -> broadcast along W (lane axis).
    out_ref[F:] = jnp.broadcast_to(row_ref[...], (F, H, W))


def prepare_position_tables(row_weight, col_weight):
    """Hoist once per module (not per forward): channel-major (F, 50) tables."""
    return row_weight.T, col_weight.T


def position_embedding_slab(h, w, row_t, col_t):
    """Batch-independent (2F, H, W) positional-encoding slab.

    row_t / col_t: channel-major (F, 50) tables from prepare_position_tables.
    """
    F = row_t.shape[0]
    # Sub-stores out_ref[:F] / out_ref[F:] need F aligned to the sublane tile.
    assert F % 8 == 0, "num_pos_feats must be a multiple of 8 (f32 sublane tile)"
    # Embedding lookup of contiguous arange == a static slice of the table.
    col_3d = col_t[:, :w].reshape(F, 1, w)   # tiny (<=128x50) slices; negligible
    row_3d = row_t[:, :h].reshape(F, h, 1)
    return pl.pallas_call(
        _pos_embed_kernel,
        out_shape=jax.ShapeDtypeStruct((2 * F, h, w), row_t.dtype),
        # Whole arrays straight into VMEM: no grid, no 1-step pipeline,
        # no double-buffered input windows.
        in_specs=[pl.BlockSpec(memory_space=pltpu.MemorySpace.VMEM),
                  pl.BlockSpec(memory_space=pltpu.MemorySpace.VMEM)],
        out_specs=pl.BlockSpec(memory_space=pltpu.MemorySpace.VMEM),
    )(col_3d, row_3d)


def position_embedding_learned(mask, row_weight, col_weight):
    """PyTorch-equivalent forward. mask: (B,H,W) shape-only. Returns (B,2F,H,W)."""
    B, H, W = mask.shape
    F = row_weight.shape[1]
    # In a real model, call prepare_position_tables once at init and cache the
    # (2F, H, W) slab per (H, W); done here per-call only to match the module API.
    row_t, col_t = prepare_position_tables(row_weight, col_weight)
    pos = position_embedding_slab(H, W, row_t, col_t)
    # TODO(synk): consumers should take the (2F, H, W) slab and fuse the batch
    # broadcast (+ add) themselves; materializing B identical copies writes
    # B x 2F*H*W*4 B to HBM for nothing.
    return jnp.broadcast_to(pos[None], (B, 2 * F, H, W))


if __name__ == "__main__":
    key = jax.random.PRNGKey(0)
    k_row, k_col, k_mask = jax.random.split(key, 3)

    num_pos_feats = 32           # small F for the test (module default is 128)
    B, H, W = 2, 16, 16

    # nn.init.uniform_ -> U[0, 1)
    row_weight = jax.random.uniform(k_row, (50, num_pos_feats), dtype=jnp.float32)
    col_weight = jax.random.uniform(k_col, (50, num_pos_feats), dtype=jnp.float32)

    mask = jax.random.bernoulli(k_mask, 0.5, (B, H, W))   # only its shape matters

    pos = position_embedding_learned(mask, row_weight, col_weight)
    pos = jax.block_until_ready(pos)

    # Pure-JAX reference mirroring the PyTorch forward.
    x_emb = col_weight[:W]                                 # (W, F)
    y_emb = row_weight[:H]                                 # (H, F)
    ref = jnp.concatenate(
        [jnp.broadcast_to(x_emb[None, :, :], (H, W, num_pos_feats)),
         jnp.broadcast_to(y_emb[:, None, :], (H, W, num_pos_feats))],
        axis=-1,
    )                                                      # (H, W, 2F)
    ref = jnp.broadcast_to(jnp.transpose(ref, (2, 0, 1))[None],
                           (B, 2 * num_pos_feats, H, W))

    assert pos.shape == (B, 2 * num_pos_feats, H, W), pos.shape
    assert pos.dtype == jnp.float32
    assert jnp.allclose(pos, ref), "mismatch vs reference"

    print("KERNEL_OK")
</pallas_src>

<mosaic_0001>
module attributes {stable_mosaic.version = 11 : i64} {
  func.func @_pos_embed_kernel(%arg0: memref<32x1x16xf32, #tpu.memory_space<vmem>>, %arg1: memref<32x16x1xf32, #tpu.memory_space<vmem>>, %arg2: memref<64x16x16xf32, #tpu.memory_space<vmem>>) attributes {dimension_semantics = [], scalar_prefetch = 0 : i64, scratch_operands = 0 : i64, tpu.core_type = #tpu.core_type<tc>} {
    %c0 = arith.constant 0 : index
    %c0_0 = arith.constant 0 : index
    %c0_1 = arith.constant 0 : index
    %0 = vector.load %arg0[%c0, %c0_0, %c0_1] : memref<32x1x16xf32, #tpu.memory_space<vmem>>, vector<32x1x16xf32>
    %1 = vector.shape_cast %0 : vector<32x1x16xf32> to vector<32x1x16xf32>
    %2 = vector.broadcast %1 : vector<32x1x16xf32> to vector<32x16x16xf32>
    %c0_2 = arith.constant 0 : index
    %c0_3 = arith.constant 0 : index
    %c0_4 = arith.constant 0 : index
    %3 = vector.load %arg2[%c0_2, %c0_3, %c0_4] : memref<64x16x16xf32, #tpu.memory_space<vmem>>, vector<32x16x16xf32>
    tpu.vector_store %arg2[%c0_2, %c0_3, %c0_4], %2 {strides = array<i32>} : memref<64x16x16xf32, #tpu.memory_space<vmem>>, vector<32x16x16xf32>,
    %c0_5 = arith.constant 0 : index
    %c0_6 = arith.constant 0 : index
    %c0_7 = arith.constant 0 : index
    %4 = vector.load %arg1[%c0_5, %c0_6, %c0_7] : memref<32x16x1xf32, #tpu.memory_space<vmem>>, vector<32x16x1xf32>
    %5 = vector.shape_cast %4 : vector<32x16x1xf32> to vector<32x16x1xf32>
    %6 = vector.broadcast %5 : vector<32x16x1xf32> to vector<32x16x16xf32>
    %c32 = arith.constant 32 : index
    %c0_8 = arith.constant 0 : index
    %c0_9 = arith.constant 0 : index
    %7 = vector.load %arg2[%c32, %c0_8, %c0_9] : memref<64x16x16xf32, #tpu.memory_space<vmem>>, vector<32x16x16xf32>
    tpu.vector_store %arg2[%c32, %c0_8, %c0_9], %6 {strides = array<i32>} : memref<64x16x16xf32, #tpu.memory_space<vmem>>, vector<32x16x16xf32>,
    return
  }
}

</mosaic_0001>

<bundles_post_ra>
// kernel: tpu_custom_call.1
= control target key start
LH: loop header
LB: loop body
LE: loop exit
PB: predicated region body
PF: predicated region fallthrough
CT: control target
= control target key end

     0   :  { %v852_v0 = vmov 0   ;;  %vm235_vm0 = vcmask 130048   ;;  %s1668_s1 = inlined_call_operand.vmem [shape: f32[32,16,1], index: 1, kind: input, shape index: {}]   ;;  %s1669_s0 = inlined_call_operand.vmem [shape: f32[32,1,16], index: 0, kind: input, shape index: {}]   ;;  %s1670_s2 = inlined_call_operand.vmem [shape: f32[64,16,16], index: 2, kind: output, shape index: {}]  }
   0x1   :  { %851 = vset.pattern.permute.xlu1 %v852_v0  ;;  %850 = vset.pattern.permute.xlu0 %v852_v0  ;;  %v302_v1 = vld [vmem:[%s1668_s1 + $0x10] sm:$0xff]  ;;  %v300_v2 = vld [vmem:[%s1668_s1] sm:$0xff]  ;;  %v303_v3 = vld [vmem:[%s1668_s1 + $0x18] sm:$0xff] }
   0x2   :  { %376 = vperm.xlu1 %851, %v302_v1   ;;  %366 = vperm.xlu0 %850, %v300_v2   ;;  %v301_v4 = vld [vmem:[%s1668_s1 + $0x8] sm:$0xff]  ;;  %v304_v6 = vld [vmem:[%s1668_s1 + $0x20] sm:$0xff]  ;;  %v307_v7 = vld [vmem:[%s1668_s1 + $0x38] sm:$0xff] }
   0x3   :  { %v305_v5 = vld [vmem:[%s1668_s1 + $0x28] sm:$0xff]  ;;  %v306_v8 = vld [vmem:[%s1668_s1 + $0x30] sm:$0xff]  ;;  %v308_v10 = vld [vmem:[%s1668_s1 + $0x40] sm:$0xff] }
   0x4   :  { %v309_v9 = vld [vmem:[%s1668_s1 + $0x48] sm:$0xff]  ;;  %v311_v11 = vld [vmem:[%s1668_s1 + $0x58] sm:$0xff]  ;;  %v310_v12 = vld [vmem:[%s1668_s1 + $0x50] sm:$0xff] }
   0x5   :  { %v313_v13 = vld [vmem:[%s1668_s1 + $0x68] sm:$0xff]  ;;  %v312_v14 = vld [vmem:[%s1668_s1 + $0x60] sm:$0xff]  ;;  %v315_v15 = vld [vmem:[%s1668_s1 + $0x78] sm:$0xff] }
   0x6   :  { %381 = vperm.xlu1 %851, %v303_v3   ;;  %371 = vperm.xlu0 %850, %v301_v4   ;;  %v314_v16 = vld [vmem:[%s1668_s1 + $0x70] sm:$0xff]  ;;  %v317_v17 = vld [vmem:[%s1668_s1 + $0x88] sm:$0xff]  ;;  %v316_v18 = vld [vmem:[%s1668_s1 + $0x80] sm:$0xff] }
   0x7   :  { %v319_v19 = vld [vmem:[%s1668_s1 + $0x98] sm:$0xff]  ;;  %v318_v20 = vld [vmem:[%s1668_s1 + $0x90] sm:$0xff]  ;;  %v321_v21 = vld [vmem:[%s1668_s1 + $0xa8] sm:$0xff] }
   0x8   :  { %v320_v22 = vld [vmem:[%s1668_s1 + $0xa0] sm:$0xff]  ;;  %v323_v23 = vld [vmem:[%s1668_s1 + $0xb8] sm:$0xff]  ;;  %v322_v24 = vld [vmem:[%s1668_s1 + $0xb0] sm:$0xff] }
   0x9   :  { %v325_v25 = vld [vmem:[%s1668_s1 + $0xc8] sm:$0xff]  ;;  %v324_v26 = vld [vmem:[%s1668_s1 + $0xc0] sm:$0xff]  ;;  %v327_v27 = vld [vmem:[%s1668_s1 + $0xd8] sm:$0xff] }
   0xa   :  { %391 = vperm.xlu1 %851, %v305_v5   ;;  %386 = vperm.xlu0 %850, %v304_v6   ;;  %v326_v28 = vld [vmem:[%s1668_s1 + $0xd0] sm:$0xff]  ;;  %v329_v29 = vld [vmem:[%s1668_s1 + $0xe8] sm:$0xff]  ;;  %v328_v30 = vld [vmem:[%s1668_s1 + $0xe0] sm:$0xff] }
   0xb   :  { %v331_v31 = vld [vmem:[%s1668_s1 + $0xf8] sm:$0xff]  ;;  %v330_v32 = vld [vmem:[%s1668_s1 + $0xf0] sm:$0xff]  ;;  %v333_v33 = vld [vmem:[%s1668_s1 + $0x108] sm:$0xff] }
   0xc   :  { %v332_v34 = vld [vmem:[%s1668_s1 + $0x100] sm:$0xff]  ;;  %v335_v35 = vld [vmem:[%s1668_s1 + $0x118] sm:$0xff]  ;;  %v334_v36 = vld [vmem:[%s1668_s1 + $0x110] sm:$0xff] }
   0xd   :  { %v337_v37 = vld [vmem:[%s1668_s1 + $0x128] sm:$0xff]  ;;  %v336_v38 = vld [vmem:[%s1668_s1 + $0x120] sm:$0xff]  ;;  %v339_v39 = vld [vmem:[%s1668_s1 + $0x138] sm:$0xff] }
   0xe   :  { %401 = vperm.xlu1 %851, %v307_v7   ;;  %396 = vperm.xlu0 %850, %v306_v8   ;;  %v338_v40 = vld [vmem:[%s1668_s1 + $0x130] sm:$0xff]  ;;  %v341_v41 = vld [vmem:[%s1668_s1 + $0x148] sm:$0xff]  ;;  %v340_v42 = vld [vmem:[%s1668_s1 + $0x140] sm:$0xff] }
   0xf   :  { %v343_v43 = vld [vmem:[%s1668_s1 + $0x158] sm:$0xff]  ;;  %v342_v44 = vld [vmem:[%s1668_s1 + $0x150] sm:$0xff]  ;;  %v345_v45 = vld [vmem:[%s1668_s1 + $0x168] sm:$0xff] }
  0x10   :  { %v344_v46 = vld [vmem:[%s1668_s1 + $0x160] sm:$0xff]  ;;  %v347_v47 = vld [vmem:[%s1668_s1 + $0x178] sm:$0xff]  ;;  %v346_v48 = vld [vmem:[%s1668_s1 + $0x170] sm:$0xff] }
  0x11   :  { %v349_v49 = vld [vmem:[%s1668_s1 + $0x188] sm:$0xff]  ;;  %v348_v50 = vld [vmem:[%s1668_s1 + $0x180] sm:$0xff]  ;;  %v351_v51 = vld [vmem:[%s1668_s1 + $0x198] sm:$0xff] }
  0x12   :  { %411 = vperm.xlu1 %851, %v309_v9   ;;  %406 = vperm.xlu0 %850, %v308_v10   ;;  %v350_v52 = vld [vmem:[%s1668_s1 + $0x190] sm:$0xff]  ;;  %v353_v53 = vld [vmem:[%s1668_s1 + $0x1a8] sm:$0xff]  ;;  %v352_v54 = vld [vmem:[%s1668_s1 + $0x1a0] sm:$0xff] }
  0x13   :  { %v355_v55 = vld [vmem:[%s1668_s1 + $0x1b8] sm:$0xff]  ;;  %v354_v56 = vld [vmem:[%s1668_s1 + $0x1b0] sm:$0xff]  ;;  %v357_v57 = vld [vmem:[%s1668_s1 + $0x1c8] sm:$0xff] }
  0x14   :  { %v356_v58 = vld [vmem:[%s1668_s1 + $0x1c0] sm:$0xff]  ;;  %v359_v59 = vld [vmem:[%s1668_s1 + $0x1d8] sm:$0xff]  ;;  %v358_v60 = vld [vmem:[%s1668_s1 + $0x1d0] sm:$0xff] }
  0x15   :  { %v361_v61 = vld [vmem:[%s1668_s1 + $0x1e8] sm:$0xff]  ;;  %v360_v62 = vld [vmem:[%s1668_s1 + $0x1e0] sm:$0xff]  ;;  %v363_v63 = vld [vmem:[%s1668_s1 + $0x1f8] sm:$0xff] }
  0x16   :  { %421 = vperm.xlu1 %851, %v311_v11   ;;  %416 = vperm.xlu0 %850, %v310_v12   ;;  %v362_v0 = vld [vmem:[%s1668_s1 + $0x1f0] sm:$0xff]  ;;  %v753_v1 = vld [vmem:[%s1669_s0] ss:$0 sm:$0xff]  ;;  %v754_v2 = vld [vmem:[%s1669_s0 + $0x1] ss:$0 sm:$0xff] }
  0x17   :  { %v755_v3 = vld [vmem:[%s1669_s0 + $0x2] ss:$0 sm:$0xff]  ;;  %v756_v4 = vld [vmem:[%s1669_s0 + $0x3] ss:$0 sm:$0xff]  ;;  %v757_v5 = vld [vmem:[%s1669_s0 + $0x4] ss:$0 sm:$0xff] }
  0x18   :  { %v758_v6 = vld [vmem:[%s1669_s0 + $0x5] ss:$0 sm:$0xff]  ;;  %236 = vst.msk [vmem:[%s1670_s2] sm:$0xff] %vm235_vm0, %v753_v1  ;;  %237 = vst.msk [vmem:[%s1670_s2 + $0x8] sm:$0xff] %vm235_vm0, %v753_v1  ;;  %v759_v7 = vld [vmem:[%s1669_s0 + $0x6] ss:$0 sm:$0xff] }
  0x19   :  { %238 = vst.msk [vmem:[%s1670_s2 + $0x10] sm:$0xff] %vm235_vm0, %v754_v2  ;;  %239 = vst.msk [vmem:[%s1670_s2 + $0x18] sm:$0xff] %vm235_vm0, %v754_v2  ;;  %v760_v8 = vld [vmem:[%s1669_s0 + $0x7] ss:$0 sm:$0xff]  ;;  %v761_v9 = vld [vmem:[%s1669_s0 + $0x8] ss:$0 sm:$0xff] }
  0x1a   :  { %431 = vperm.xlu1 %851, %v313_v13   ;;  %426 = vperm.xlu0 %850, %v312_v14   ;;  %240 = vst.msk [vmem:[%s1670_s2 + $0x20] sm:$0xff] %vm235_vm0, %v755_v3  ;;  %241 = vst.msk [vmem:[%s1670_s2 + $0x28] sm:$0xff] %vm235_vm0, %v755_v3  ;;  %v762_v10 = vld [vmem:[%s1669_s0 + $0x9] ss:$0 sm:$0xff]  ;;  %v763_v11 = vld [vmem:[%s1669_s0 + $0xa] ss:$0 sm:$0xff] }
  0x1b   :  { %242 = vst.msk [vmem:[%s1670_s2 + $0x30] sm:$0xff] %vm235_vm0, %v756_v4  ;;  %243 = vst.msk [vmem:[%s1670_s2 + $0x38] sm:$0xff] %vm235_vm0, %v756_v4  ;;  %v764_v12 = vld [vmem:[%s1669_s0 + $0xb] ss:$0 sm:$0xff] }
  0x1c   :  { %244 = vst.msk [vmem:[%s1670_s2 + $0x40] sm:$0xff] %vm235_vm0, %v757_v5  ;;  %245 = vst.msk [vmem:[%s1670_s2 + $0x48] sm:$0xff] %vm235_vm0, %v757_v5 }
  0x1d   :  { %246 = vst.msk [vmem:[%s1670_s2 + $0x50] sm:$0xff] %vm235_vm0, %v758_v6  ;;  %247 = vst.msk [vmem:[%s1670_s2 + $0x58] sm:$0xff] %vm235_vm0, %v758_v6 }
  0x1e   :  { %441 = vperm.xlu1 %851, %v315_v15   ;;  %436 = vperm.xlu0 %850, %v314_v16   ;;  %248 = vst.msk [vmem:[%s1670_s2 + $0x60] sm:$0xff] %vm235_vm0, %v759_v7  ;;  %249 = vst.msk [vmem:[%s1670_s2 + $0x68] sm:$0xff] %vm235_vm0, %v759_v7  ;;  %v765_v15 = vld [vmem:[%s1669_s0 + $0xc] ss:$0 sm:$0xff]  ;;  %v766_v16 = vld [vmem:[%s1669_s0 + $0xd] ss:$0 sm:$0xff] }
  0x1f   :  { %250 = vst.msk [vmem:[%s1670_s2 + $0x70] sm:$0xff] %vm235_vm0, %v760_v8  ;;  %251 = vst.msk [vmem:[%s1670_s2 + $0x78] sm:$0xff] %vm235_vm0, %v760_v8 }
  0x20   :  { %252 = vst.msk [vmem:[%s1670_s2 + $0x80] sm:$0xff] %vm235_vm0, %v761_v9  ;;  %253 = vst.msk [vmem:[%s1670_s2 + $0x88] sm:$0xff] %vm235_vm0, %v761_v9 }
  0x21   :  { %254 = vst.msk [vmem:[%s1670_s2 + $0x90] sm:$0xff] %vm235_vm0, %v762_v10  ;;  %255 = vst.msk [vmem:[%s1670_s2 + $0x98] sm:$0xff] %vm235_vm0, %v762_v10 }
  0x22   :  { %451 = vperm.xlu1 %851, %v317_v17   ;;  %446 = vperm.xlu0 %850, %v316_v18   ;;  %v767_v17 = vld [vmem:[%s1669_s0 + $0xe] ss:$0 sm:$0xff]  ;;  %256 = vst.msk [vmem:[%s1670_s2 + $0xa0] sm:$0xff] %vm235_vm0, %v763_v11  ;;  %257 = vst.msk [vmem:[%s1670_s2 + $0xa8] sm:$0xff] %vm235_vm0, %v763_v11  ;;  %v768_v18 = vld [vmem:[%s1669_s0 + $0xf] ss:$0 sm:$0xff] }
  0x23   :  { %258 = vst.msk [vmem:[%s1670_s2 + $0xb0] sm:$0xff] %vm235_vm0, %v764_v12  ;;  %259 = vst.msk [vmem:[%s1670_s2 + $0xb8] sm:$0xff] %vm235_vm0, %v764_v12 }
  0x24   :  { %260 = vst.msk [vmem:[%s1670_s2 + $0xc0] sm:$0xff] %vm235_vm0, %v765_v15  ;;  %261 = vst.msk [vmem:[%s1670_s2 + $0xc8] sm:$0xff] %vm235_vm0, %v765_v15 }
  0x25   :  { %262 = vst.msk [vmem:[%s1670_s2 + $0xd0] sm:$0xff] %vm235_vm0, %v766_v16  ;;  %263 = vst.msk [vmem:[%s1670_s2 + $0xd8] sm:$0xff] %vm235_vm0, %v766_v16 }
  0x26   :  { %461 = vperm.xlu1 %851, %v319_v19   ;;  %456 = vperm.xlu0 %850, %v318_v20   ;;  %v769_v19 = vld [vmem:[%s1669_s0 + $0x10] ss:$0 sm:$0xff]  ;;  %v770_v20 = vld [vmem:[%s1669_s0 + $0x11] ss:$0 sm:$0xff]  ;;  %264 = vst.msk [vmem:[%s1670_s2 + $0xe0] sm:$0xff] %vm235_vm0, %v767_v17  ;;  %265 = vst.msk [vmem:[%s1670_s2 + $0xe8] sm:$0xff] %vm235_vm0, %v767_v17 }
  0x27   :  { %266 = vst.msk [vmem:[%s1670_s2 + $0xf0] sm:$0xff] %vm235_vm0, %v768_v18  ;;  %267 = vst.msk [vmem:[%s1670_s2 + $0xf8] sm:$0xff] %vm235_vm0, %v768_v18 }
  0x28   :  { %268 = vst.msk [vmem:[%s1670_s2 + $0x100] sm:$0xff] %vm235_vm0, %v769_v19  ;;  %269 = vst.msk [vmem:[%s1670_s2 + $0x108] sm:$0xff] %vm235_vm0, %v769_v19 }
  0x29   :  { %270 = vst.msk [vmem:[%s1670_s2 + $0x110] sm:$0xff] %vm235_vm0, %v770_v20  ;;  %271 = vst.msk [vmem:[%s1670_s2 + $0x118] sm:$0xff] %vm235_vm0, %v770_v20 }
  0x2a   :  { %471 = vperm.xlu1 %851, %v321_v21   ;;  %466 = vperm.xlu0 %850, %v320_v22   ;;  %v771_v21 = vld [vmem:[%s1669_s0 + $0x12] ss:$0 sm:$0xff]  ;;  %v772_v22 = vld [vmem:[%s1669_s0 + $0x13] ss:$0 sm:$0xff] }
  0x2b   :  { %272 = vst.msk [vmem:[%s1670_s2 + $0x120] sm:$0xff] %vm235_vm0, %v771_v21  ;;  %273 = vst.msk [vmem:[%s1670_s2 + $0x128] sm:$0xff] %vm235_vm0, %v771_v21 }
  0x2c   :  { %274 = vst.msk [vmem:[%s1670_s2 + $0x130] sm:$0xff] %vm235_vm0, %v772_v22  ;;  %275 = vst.msk [vmem:[%s1670_s2 + $0x138] sm:$0xff] %vm235_vm0, %v772_v22 }
  0x2e   :  { %481 = vperm.xlu1 %851, %v323_v23   ;;  %476 = vperm.xlu0 %850, %v322_v24   ;;  %v773_v23 = vld [vmem:[%s1669_s0 + $0x14] ss:$0 sm:$0xff]  ;;  %v774_v24 = vld [vmem:[%s1669_s0 + $0x15] ss:$0 sm:$0xff] }
  0x2f   :  { %276 = vst.msk [vmem:[%s1670_s2 + $0x140] sm:$0xff] %vm235_vm0, %v773_v23  ;;  %277 = vst.msk [vmem:[%s1670_s2 + $0x148] sm:$0xff] %vm235_vm0, %v773_v23 }
  0x30   :  { %278 = vst.msk [vmem:[%s1670_s2 + $0x150] sm:$0xff] %vm235_vm0, %v774_v24  ;;  %279 = vst.msk [vmem:[%s1670_s2 + $0x158] sm:$0xff] %vm235_vm0, %v774_v24 }
  0x32   :  { %491 = vperm.xlu1 %851, %v325_v25   ;;  %486 = vperm.xlu0 %850, %v324_v26   ;;  %v775_v25 = vld [vmem:[%s1669_s0 + $0x16] ss:$0 sm:$0xff]  ;;  %v776_v26 = vld [vmem:[%s1669_s0 + $0x17] ss:$0 sm:$0xff] }
  0x33   :  { %280 = vst.msk [vmem:[%s1670_s2 + $0x160] sm:$0xff] %vm235_vm0, %v775_v25  ;;  %281 = vst.msk [vmem:[%s1670_s2 + $0x168] sm:$0xff] %vm235_vm0, %v775_v25 }
  0x34   :  { %282 = vst.msk [vmem:[%s1670_s2 + $0x170] sm:$0xff] %vm235_vm0, %v776_v26  ;;  %283 = vst.msk [vmem:[%s1670_s2 + $0x178] sm:$0xff] %vm235_vm0, %v776_v26 }
  0x36   :  { %501 = vperm.xlu1 %851, %v327_v27   ;;  %496 = vperm.xlu0 %850, %v326_v28  }
  0x3a   :  { %511 = vperm.xlu1 %851, %v329_v29   ;;  %506 = vperm.xlu0 %850, %v328_v30   ;;  %v777_v29 = vld [vmem:[%s1669_s0 + $0x18] ss:$0 sm:$0xff]  ;;  %v778_v30 = vld [vmem:[%s1669_s0 + $0x19] ss:$0 sm:$0xff] }
  0x3b   :  { %284 = vst.msk [vmem:[%s1670_s2 + $0x180] sm:$0xff] %vm235_vm0, %v777_v29  ;;  %285 = vst.msk [vmem:[%s1670_s2 + $0x188] sm:$0xff] %vm235_vm0, %v777_v29 }
  0x3c   :  { %286 = vst.msk [vmem:[%s1670_s2 + $0x190] sm:$0xff] %vm235_vm0, %v778_v30  ;;  %287 = vst.msk [vmem:[%s1670_s2 + $0x198] sm:$0xff] %vm235_vm0, %v778_v30 }
  0x3e   :  { %521 = vperm.xlu1 %851, %v331_v31   ;;  %516 = vperm.xlu0 %850, %v330_v32   ;;  %v779_v31 = vld [vmem:[%s1669_s0 + $0x1a] ss:$0 sm:$0xff]  ;;  %v780_v32 = vld [vmem:[%s1669_s0 + $0x1b] ss:$0 sm:$0xff] }
  0x3f   :  { %288 = vst.msk [vmem:[%s1670_s2 + $0x1a0] sm:$0xff] %vm235_vm0, %v779_v31  ;;  %289 = vst.msk [vmem:[%s1670_s2 + $0x1a8] sm:$0xff] %vm235_vm0, %v779_v31 }
  0x40   :  { %290 = vst.msk [vmem:[%s1670_s2 + $0x1b0] sm:$0xff] %vm235_vm0, %v780_v32  ;;  %291 = vst.msk [vmem:[%s1670_s2 + $0x1b8] sm:$0xff] %vm235_vm0, %v780_v32 }
  0x42   :  { %531 = vperm.xlu1 %851, %v333_v33   ;;  %526 = vperm.xlu0 %850, %v332_v34   ;;  %v781_v33 = vld [vmem:[%s1669_s0 + $0x1c] ss:$0 sm:$0xff]  ;;  %v782_v34 = vld [vmem:[%s1669_s0 + $0x1d] ss:$0 sm:$0xff] }
  0x43   :  { %292 = vst.msk [vmem:[%s1670_s2 + $0x1c0] sm:$0xff] %vm235_vm0, %v781_v33  ;;  %293 = vst.msk [vmem:[%s1670_s2 + $0x1c8] sm:$0xff] %vm235_vm0, %v781_v33 }
  0x44   :  { %294 = vst.msk [vmem:[%s1670_s2 + $0x1d0] sm:$0xff] %vm235_vm0, %v782_v34  ;;  %295 = vst.msk [vmem:[%s1670_s2 + $0x1d8] sm:$0xff] %vm235_vm0, %v782_v34 }
  0x46   :  { %541 = vperm.xlu1 %851, %v335_v35   ;;  %536 = vperm.xlu0 %850, %v334_v36   ;;  %v783_v35 = vld [vmem:[%s1669_s0 + $0x1e] ss:$0 sm:$0xff]  ;;  %v784_v36 = vld [vmem:[%s1669_s0 + $0x1f] ss:$0 sm:$0xff] }
  0x47   :  { %296 = vst.msk [vmem:[%s1670_s2 + $0x1e0] sm:$0xff] %vm235_vm0, %v783_v35  ;;  %297 = vst.msk [vmem:[%s1670_s2 + $0x1e8] sm:$0xff] %vm235_vm0, %v783_v35 }
  0x48   :  { %298 = vst.msk [vmem:[%s1670_s2 + $0x1f0] sm:$0xff] %vm235_vm0, %v784_v36  ;;  %299 = vst.msk [vmem:[%s1670_s2 + $0x1f8] sm:$0xff] %vm235_vm0, %v784_v36 }
  0x4a   :  { %551 = vperm.xlu1 %851, %v337_v37   ;;  %546 = vperm.xlu0 %850, %v336_v38  }
  0x4e   :  { %561 = vperm.xlu1 %851, %v339_v39   ;;  %556 = vperm.xlu0 %850, %v338_v40  }
  0x52   :  { %571 = vperm.xlu1 %851, %v341_v41   ;;  %566 = vperm.xlu0 %850, %v340_v42  }
  0x56   :  { %581 = vperm.xlu1 %851, %v343_v43   ;;  %576 = vperm.xlu0 %850, %v342_v44  }
  0x5a   :  { %591 = vperm.xlu1 %851, %v345_v45   ;;  %586 = vperm.xlu0 %850, %v344_v46  }
  0x5e   :  { %601 = vperm.xlu1 %851, %v347_v47   ;;  %596 = vperm.xlu0 %850, %v346_v48  }
  0x62   :  { %611 = vperm.xlu1 %851, %v349_v49   ;;  %606 = vperm.xlu0 %850, %v348_v50  }
  0x66   :  { %621 = vperm.xlu1 %851, %v351_v51   ;;  %616 = vperm.xlu0 %850, %v350_v52  }
  0x6a   :  { %631 = vperm.xlu1 %851, %v353_v53   ;;  %626 = vperm.xlu0 %850, %v352_v54  }
  0x6e   :  { %641 = vperm.xlu1 %851, %v355_v55   ;;  %636 = vperm.xlu0 %850, %v354_v56  }
  0x72   :  { %651 = vperm.xlu1 %851, %v357_v57   ;;  %646 = vperm.xlu0 %850, %v356_v58  }
  0x76   :  { %661 = vperm.xlu1 %851, %v359_v59   ;;  %656 = vperm.xlu0 %850, %v358_v60  }
  0x7a   :  { %671 = vperm.xlu1 %851, %v361_v61   ;;  %666 = vperm.xlu0 %850, %v360_v62  }
  0x7e   :  { %681 = vperm.xlu1 %851, %v363_v63   ;;  %676 = vperm.xlu0 %850, %v362_v0  }
  0x81   :  { %v377_v13 = vpop.permute.xlu1 %376  ;;  %v367_v14 = vpop.permute.xlu0 %366 }
  0x82   :  { %787 = vst.msk [vmem:[%s1670_s2 + $0x210] sm:$0xff] %vm235_vm0, %v377_v13  ;;  %785 = vst.msk [vmem:[%s1670_s2 + $0x200] sm:$0xff] %vm235_vm0, %v367_v14 }
  0x85   :  { %v382_v27 = vpop.permute.xlu1 %381  ;;  %v372_v28 = vpop.permute.xlu0 %371 }
  0x86   :  { %788 = vst.msk [vmem:[%s1670_s2 + $0x218] sm:$0xff] %vm235_vm0, %v382_v27  ;;  %786 = vst.msk [vmem:[%s1670_s2 + $0x208] sm:$0xff] %vm235_vm0, %v372_v28 }
  0x89   :  { %v392_v37 = vpop.permute.xlu1 %391  ;;  %v387_v38 = vpop.permute.xlu0 %386 }
  0x8a   :  { %790 = vst.msk [vmem:[%s1670_s2 + $0x228] sm:$0xff] %vm235_vm0, %v392_v37  ;;  %789 = vst.msk [vmem:[%s1670_s2 + $0x220] sm:$0xff] %vm235_vm0, %v387_v38 }
  0x8d   :  { %v402_v39 = vpop.permute.xlu1 %401  ;;  %v397_v40 = vpop.permute.xlu0 %396 }
  0x8e   :  { %792 = vst.msk [vmem:[%s1670_s2 + $0x238] sm:$0xff] %vm235_vm0, %v402_v39  ;;  %791 = vst.msk [vmem:[%s1670_s2 + $0x230] sm:$0xff] %vm235_vm0, %v397_v40 }
  0x91   :  { %v412_v41 = vpop.permute.xlu1 %411  ;;  %v407_v42 = vpop.permute.xlu0 %406 }
  0x92   :  { %794 = vst.msk [vmem:[%s1670_s2 + $0x248] sm:$0xff] %vm235_vm0, %v412_v41  ;;  %793 = vst.msk [vmem:[%s1670_s2 + $0x240] sm:$0xff] %vm235_vm0, %v407_v42 }
  0x95   :  { %v422_v43 = vpop.permute.xlu1 %421  ;;  %v417_v44 = vpop.permute.xlu0 %416 }
  0x96   :  { %796 = vst.msk [vmem:[%s1670_s2 + $0x258] sm:$0xff] %vm235_vm0, %v422_v43  ;;  %795 = vst.msk [vmem:[%s1670_s2 + $0x250] sm:$0xff] %vm235_vm0, %v417_v44 }
  0x99   :  { %v432_v45 = vpop.permute.xlu1 %431  ;;  %v427_v46 = vpop.permute.xlu0 %426 }
  0x9a   :  { %798 = vst.msk [vmem:[%s1670_s2 + $0x268] sm:$0xff] %vm235_vm0, %v432_v45  ;;  %797 = vst.msk [vmem:[%s1670_s2 + $0x260] sm:$0xff] %vm235_vm0, %v427_v46 }
  0x9d   :  { %v442_v47 = vpop.permute.xlu1 %441  ;;  %v437_v48 = vpop.permute.xlu0 %436 }
  0x9e   :  { %800 = vst.msk [vmem:[%s1670_s2 + $0x278] sm:$0xff] %vm235_vm0, %v442_v47  ;;  %799 = vst.msk [vmem:[%s1670_s2 + $0x270] sm:$0xff] %vm235_vm0, %v437_v48 }
  0xa1   :  { %v452_v49 = vpop.permute.xlu1 %451  ;;  %v447_v50 = vpop.permute.xlu0 %446 }
  0xa2   :  { %802 = vst.msk [vmem:[%s1670_s2 + $0x288] sm:$0xff] %vm235_vm0, %v452_v49  ;;  %801 = vst.msk [vmem:[%s1670_s2 + $0x280] sm:$0xff] %vm235_vm0, %v447_v50 }
  0xa5   :  { %v462_v51 = vpop.permute.xlu1 %461  ;;  %v457_v52 = vpop.permute.xlu0 %456 }
  0xa6   :  { %804 = vst.msk [vmem:[%s1670_s2 + $0x298] sm:$0xff] %vm235_vm0, %v462_v51  ;;  %803 = vst.msk [vmem:[%s1670_s2 + $0x290] sm:$0xff] %vm235_vm0, %v457_v52 }
  0xa9   :  { %v472_v53 = vpop.permute.xlu1 %471  ;;  %v467_v54 = vpop.permute.xlu0 %466 }
  0xaa   :  { %806 = vst.msk [vmem:[%s1670_s2 + $0x2a8] sm:$0xff] %vm235_vm0, %v472_v53  ;;  %805 = vst.msk [vmem:[%s1670_s2 + $0x2a0] sm:$0xff] %vm235_vm0, %v467_v54 }
  0xad   :  { %v482_v55 = vpop.permute.xlu1 %481  ;;  %v477_v56 = vpop.permute.xlu0 %476 }
  0xae   :  { %808 = vst.msk [vmem:[%s1670_s2 + $0x2b8] sm:$0xff] %vm235_vm0, %v482_v55  ;;  %807 = vst.msk [vmem:[%s1670_s2 + $0x2b0] sm:$0xff] %vm235_vm0, %v477_v56 }
  0xb1   :  { %v492_v57 = vpop.permute.xlu1 %491  ;;  %v487_v58 = vpop.permute.xlu0 %486 }
  0xb2   :  { %810 = vst.msk [vmem:[%s1670_s2 + $0x2c8] sm:$0xff] %vm235_vm0, %v492_v57  ;;  %809 = vst.msk [vmem:[%s1670_s2 + $0x2c0] sm:$0xff] %vm235_vm0, %v487_v58 }
  0xb5   :  { %v502_v59 = vpop.permute.xlu1 %501  ;;  %v497_v60 = vpop.permute.xlu0 %496 }
  0xb6   :  { %812 = vst.msk [vmem:[%s1670_s2 + $0x2d8] sm:$0xff] %vm235_vm0, %v502_v59  ;;  %811 = vst.msk [vmem:[%s1670_s2 + $0x2d0] sm:$0xff] %vm235_vm0, %v497_v60 }
  0xb9   :  { %v512_v61 = vpop.permute.xlu1 %511  ;;  %v507_v62 = vpop.permute.xlu0 %506 }
  0xba   :  { %814 = vst.msk [vmem:[%s1670_s2 + $0x2e8] sm:$0xff] %vm235_vm0, %v512_v61  ;;  %813 = vst.msk [vmem:[%s1670_s2 + $0x2e0] sm:$0xff] %vm235_vm0, %v507_v62 }
  0xbd   :  { %v522_v63 = vpop.permute.xlu1 %521  ;;  %v517_v0 = vpop.permute.xlu0 %516 }
  0xbe   :  { %816 = vst.msk [vmem:[%s1670_s2 + $0x2f8] sm:$0xff] %vm235_vm0, %v522_v63  ;;  %815 = vst.msk [vmem:[%s1670_s2 + $0x2f0] sm:$0xff] %vm235_vm0, %v517_v0 }
  0xc1   :  { %v532_v1 = vpop.permute.xlu1 %531  ;;  %v527_v2 = vpop.permute.xlu0 %526 }
  0xc2   :  { %818 = vst.msk [vmem:[%s1670_s2 + $0x308] sm:$0xff] %vm235_vm0, %v532_v1  ;;  %817 = vst.msk [vmem:[%s1670_s2 + $0x300] sm:$0xff] %vm235_vm0, %v527_v2 }
  0xc5   :  { %v542_v3 = vpop.permute.xlu1 %541  ;;  %v537_v4 = vpop.permute.xlu0 %536 }
  0xc6   :  { %820 = vst.msk [vmem:[%s1670_s2 + $0x318] sm:$0xff] %vm235_vm0, %v542_v3  ;;  %819 = vst.msk [vmem:[%s1670_s2 + $0x310] sm:$0xff] %vm235_vm0, %v537_v4 }
  0xc9   :  { %v552_v5 = vpop.permute.xlu1 %551  ;;  %v547_v6 = vpop.permute.xlu0 %546 }
  0xca   :  { %822 = vst.msk [vmem:[%s1670_s2 + $0x328] sm:$0xff] %vm235_vm0, %v552_v5  ;;  %821 = vst.msk [vmem:[%s1670_s2 + $0x320] sm:$0xff] %vm235_vm0, %v547_v6 }
  0xcd   :  { %v562_v7 = vpop.permute.xlu1 %561  ;;  %v557_v8 = vpop.permute.xlu0 %556 }
  0xce   :  { %824 = vst.msk [vmem:[%s1670_s2 + $0x338] sm:$0xff] %vm235_vm0, %v562_v7  ;;  %823 = vst.msk [vmem:[%s1670_s2 + $0x330] sm:$0xff] %vm235_vm0, %v557_v8 }
  0xd1   :  { %v572_v9 = vpop.permute.xlu1 %571  ;;  %v567_v10 = vpop.permute.xlu0 %566 }
  0xd2   :  { %826 = vst.msk [vmem:[%s1670_s2 + $0x348] sm:$0xff] %vm235_vm0, %v572_v9  ;;  %825 = vst.msk [vmem:[%s1670_s2 + $0x340] sm:$0xff] %vm235_vm0, %v567_v10 }
  0xd5   :  { %v582_v11 = vpop.permute.xlu1 %581  ;;  %v577_v12 = vpop.permute.xlu0 %576 }
  0xd6   :  { %828 = vst.msk [vmem:[%s1670_s2 + $0x358] sm:$0xff] %vm235_vm0, %v582_v11  ;;  %827 = vst.msk [vmem:[%s1670_s2 + $0x350] sm:$0xff] %vm235_vm0, %v577_v12 }
  0xd9   :  { %v592_v13 = vpop.permute.xlu1 %591  ;;  %v587_v14 = vpop.permute.xlu0 %586 }
  0xda   :  { %830 = vst.msk [vmem:[%s1670_s2 + $0x368] sm:$0xff] %vm235_vm0, %v592_v13  ;;  %829 = vst.msk [vmem:[%s1670_s2 + $0x360] sm:$0xff] %vm235_vm0, %v587_v14 }
  0xdd   :  { %v602_v15 = vpop.permute.xlu1 %601  ;;  %v597_v16 = vpop.permute.xlu0 %596 }
  0xde   :  { %832 = vst.msk [vmem:[%s1670_s2 + $0x378] sm:$0xff] %vm235_vm0, %v602_v15  ;;  %831 = vst.msk [vmem:[%s1670_s2 + $0x370] sm:$0xff] %vm235_vm0, %v597_v16 }
  0xe1   :  { %v612_v17 = vpop.permute.xlu1 %611  ;;  %v607_v18 = vpop.permute.xlu0 %606 }
  0xe2   :  { %834 = vst.msk [vmem:[%s1670_s2 + $0x388] sm:$0xff] %vm235_vm0, %v612_v17  ;;  %833 = vst.msk [vmem:[%s1670_s2 + $0x380] sm:$0xff] %vm235_vm0, %v607_v18 }
  0xe5   :  { %v622_v19 = vpop.permute.xlu1 %621  ;;  %v617_v20 = vpop.permute.xlu0 %616 }
  0xe6   :  { %836 = vst.msk [vmem:[%s1670_s2 + $0x398] sm:$0xff] %vm235_vm0, %v622_v19  ;;  %835 = vst.msk [vmem:[%s1670_s2 + $0x390] sm:$0xff] %vm235_vm0, %v617_v20 }
  0xe9   :  { %v632_v21 = vpop.permute.xlu1 %631  ;;  %v627_v22 = vpop.permute.xlu0 %626 }
  0xea   :  { %838 = vst.msk [vmem:[%s1670_s2 + $0x3a8] sm:$0xff] %vm235_vm0, %v632_v21  ;;  %837 = vst.msk [vmem:[%s1670_s2 + $0x3a0] sm:$0xff] %vm235_vm0, %v627_v22 }
  0xed   :  { %v642_v23 = vpop.permute.xlu1 %641  ;;  %v637_v24 = vpop.permute.xlu0 %636 }
  0xee   :  { %840 = vst.msk [vmem:[%s1670_s2 + $0x3b8] sm:$0xff] %vm235_vm0, %v642_v23  ;;  %839 = vst.msk [vmem:[%s1670_s2 + $0x3b0] sm:$0xff] %vm235_vm0, %v637_v24 }
  0xf1   :  { %v652_v25 = vpop.permute.xlu1 %651  ;;  %v647_v26 = vpop.permute.xlu0 %646 }
  0xf2   :  { %842 = vst.msk [vmem:[%s1670_s2 + $0x3c8] sm:$0xff] %vm235_vm0, %v652_v25  ;;  %841 = vst.msk [vmem:[%s1670_s2 + $0x3c0] sm:$0xff] %vm235_vm0, %v647_v26 }
  0xf5   :  { %v662_v27 = vpop.permute.xlu1 %661  ;;  %v657_v28 = vpop.permute.xlu0 %656 }
  0xf6   :  { %844 = vst.msk [vmem:[%s1670_s2 + $0x3d8] sm:$0xff] %vm235_vm0, %v662_v27  ;;  %843 = vst.msk [vmem:[%s1670_s2 + $0x3d0] sm:$0xff] %vm235_vm0, %v657_v28 }
  0xf9   :  { %v672_v29 = vpop.permute.xlu1 %671  ;;  %v667_v30 = vpop.permute.xlu0 %666 }
  0xfa   :  { %846 = vst.msk [vmem:[%s1670_s2 + $0x3e8] sm:$0xff] %vm235_vm0, %v672_v29  ;;  %845 = vst.msk [vmem:[%s1670_s2 + $0x3e0] sm:$0xff] %vm235_vm0, %v667_v30 }
  0xfd   :  { %v682_v31 = vpop.permute.xlu1 %681  ;;  %v677_v32 = vpop.permute.xlu0 %676 }
  0xfe   :  { %848 = vst.msk [vmem:[%s1670_s2 + $0x3f8] sm:$0xff] %vm235_vm0, %v682_v31  ;;  %847 = vst.msk [vmem:[%s1670_s2 + $0x3f0] sm:$0xff] %vm235_vm0, %v677_v32 }

</bundles_post_ra>
